<compile_context>
chip_gen: v7x
topology: tpu7x:2x2x1
jax: 0.10.0
libtpu: 0.0.40
codegen_flags: <defaults>
</compile_context>

<pallas_src>
import functools

import jax
import jax.numpy as jnp
from jax.experimental import pallas as pl
from jax.experimental.pallas import tpu as pltpu


def _soft_ce_kernel(x_ref, t_ref, out_ref, acc_ref, *, n_rows: int, tile_n: int):
    i = pl.program_id(0)

    x = x_ref[...].astype(jnp.float32)   # (TILE_N, C)
    t = t_ref[...].astype(jnp.float32)   # (TILE_N, C)

    # Numerically stable per-row logsumexp pieces (no full logprob temp).
    m = jnp.max(x, axis=-1, keepdims=True)                      # (TILE_N, 1)
    se = jnp.sum(jnp.exp(x - m), axis=-1, keepdims=True)        # (TILE_N, 1)
    lse = m + jnp.log(se)                                       # (TILE_N, 1)

    tx = jnp.sum(t * x, axis=-1, keepdims=True)                 # (TILE_N, 1)
    tsum = jnp.sum(t, axis=-1, keepdims=True)                   # (TILE_N, 1)

    # loss_i = sum_j -t_ij * (x_ij - lse_i) = lse_i * sum_j t_ij - sum_j t_ij x_ij
    row_loss = tsum * lse - tx                                  # (TILE_N, 1)

    # Mask rows past the true batch size (padded last block).
    row_id = i * tile_n + jax.lax.broadcasted_iota(jnp.int32, row_loss.shape, 0)
    row_loss = jnp.where(row_id < n_rows, row_loss, 0.0)

    partial = jnp.sum(row_loss)

    @pl.when(i == 0)
    def _():
        acc_ref[0] = 0.0

    acc_ref[0] += partial

    # Output block is resident across the grid; last write is the final value.
    out_ref[0, 0] = acc_ref[0] * (1.0 / n_rows)


def _pick_tile_n(n: int, c: int, x_itemsize: int, t_itemsize: int,
                 vmem_budget_bytes: int = 16 * 1024 * 1024) -> int:
    """Largest row tile whose double-buffered input blocks fit the budget."""
    per_row = c * (x_itemsize + t_itemsize)
    max_rows = max(8, vmem_budget_bytes // (2 * per_row))   # 2x: double buffering
    tile = int(min(n, max_rows, 1024))
    if tile < n:
        tile = max(8, (tile // 8) * 8)   # sublane alignment for partial tiling
    return tile


def soft_target_cross_entropy(x, target, *, tile_n: int | None = None):
    """x: (N, C) logits (f32 or bf16); target: (N, C) soft distribution. Scalar loss."""
    n, c = x.shape
    assert target.shape == (n, c), (target.shape, x.shape)

    if tile_n is None:
        tile_n = _pick_tile_n(n, c, x.dtype.itemsize, target.dtype.itemsize)
    grid = (pl.cdiv(n, tile_n),)

    kernel = functools.partial(_soft_ce_kernel, n_rows=n, tile_n=tile_n)

    out = pl.pallas_call(
        kernel,
        out_shape=jax.ShapeDtypeStruct((1, 1), jnp.float32),
        grid_spec=pltpu.PrefetchScalarGridSpec(
            num_scalar_prefetch=0,
            grid=grid,
            in_specs=[
                pl.BlockSpec((tile_n, c), lambda i: (i, 0)),
                pl.BlockSpec((tile_n, c), lambda i: (i, 0)),
            ],
            out_specs=pl.BlockSpec(memory_space=pltpu.MemorySpace.SMEM),
            scratch_shapes=[pltpu.SMEM((1,), jnp.float32)],
        ),
        compiler_params=pltpu.CompilerParams(
            dimension_semantics=("arbitrary",),
            vmem_limit_bytes=32 * 1024 * 1024,
        ),
        cost_estimate=pl.CostEstimate(
            flops=6 * n * c,
            transcendentals=n * c,
            bytes_accessed=n * c * (x.dtype.itemsize + target.dtype.itemsize) + 4,
        ),
    )(x, target)
    return out[0, 0]


def _reference(x, target):
    logp = jax.nn.log_softmax(x.astype(jnp.float32), axis=-1)
    return jnp.mean(jnp.sum(-target.astype(jnp.float32) * logp, axis=-1))


if __name__ == "__main__":
    key = jax.random.PRNGKey(0)

    # Case 1: f32, N not a multiple of the tile (exercises grid + row masking).
    k1, k2, k3, k4 = jax.random.split(key, 4)
    N1, C1 = 20, 128
    x1 = jax.random.normal(k1, (N1, C1), dtype=jnp.float32)
    t1 = jax.nn.softmax(jax.random.normal(k2, (N1, C1), dtype=jnp.float32), axis=-1)
    loss1 = soft_target_cross_entropy(x1, t1, tile_n=8)
    jax.block_until_ready(loss1)
    ref1 = _reference(x1, t1)
    assert jnp.allclose(loss1, ref1, atol=1e-5, rtol=1e-5), (loss1, ref1)

    # Case 2: bf16 logits/targets read natively, cast to f32 in-kernel.
    N2, C2 = 16, 256
    x2 = jax.random.normal(k3, (N2, C2), dtype=jnp.float32).astype(jnp.bfloat16)
    t2 = jax.nn.softmax(
        jax.random.normal(k4, (N2, C2), dtype=jnp.float32), axis=-1
    ).astype(jnp.bfloat16)
    loss2 = soft_target_cross_entropy(x2, t2)
    jax.block_until_ready(loss2)
    ref2 = _reference(x2, t2)
    assert jnp.allclose(loss2, ref2, atol=2e-2, rtol=2e-2), (loss2, ref2)

    print("KERNEL_OK")
</pallas_src>

<mosaic_0001>
module attributes {stable_mosaic.version = 11 : i64} {
  func.func @_soft_ce_kernel(%arg0: i32, %arg1: memref<8x128xf32, #tpu.memory_space<vmem>>, %arg2: memref<8x128xf32, #tpu.memory_space<vmem>>, %arg3: memref<1x1xf32, #tpu.memory_space<smem>>, %arg4: memref<1xf32, #tpu.memory_space<smem>>) attributes {dimension_semantics = [#tpu.dimension_semantics<arbitrary>], iteration_bounds = array<i64: 3>, scalar_prefetch = 0 : i64, scratch_operands = 1 : i64, tpu.core_type = #tpu.core_type<tc>, window_params = [{transform_indices = @transform_0, window_bounds = array<i64: 8, 128>}, {transform_indices = @transform_1, window_bounds = array<i64: 8, 128>}, {transform_indices = @transform_2, window_bounds = array<i64: 1, 1>}]} {
    %c0 = arith.constant 0 : index
    %c0_0 = arith.constant 0 : index
    %0 = vector.load %arg1[%c0, %c0_0] : memref<8x128xf32, #tpu.memory_space<vmem>>, vector<8x128xf32>
    %c0_1 = arith.constant 0 : index
    %c0_2 = arith.constant 0 : index
    %1 = vector.load %arg2[%c0_1, %c0_2] : memref<8x128xf32, #tpu.memory_space<vmem>>, vector<8x128xf32>
    %cst = arith.constant dense<0xFF800000> : vector<8xf32>
    %2 = vector.multi_reduction <maximumf>, %0, %cst [1] : vector<8x128xf32> to vector<8xf32>
    %3 = vector.shape_cast %2 : vector<8xf32> to vector<8x1xf32>
    %4 = vector.broadcast %3 : vector<8x1xf32> to vector<8x128xf32>
    %5 = arith.subf %0, %4 : vector<8x128xf32>
    %6 = math.exp %5 : vector<8x128xf32>
    %cst_3 = arith.constant dense<0.000000e+00> : vector<8xf32>
    %7 = vector.multi_reduction <add>, %6, %cst_3 [1] : vector<8x128xf32> to vector<8xf32>
    %8 = vector.shape_cast %7 : vector<8xf32> to vector<8x1xf32>
    %9 = math.log %8 : vector<8x1xf32>
    %10 = arith.addf %3, %9 : vector<8x1xf32>
    %11 = arith.mulf %1, %0 : vector<8x128xf32>
    %cst_4 = arith.constant dense<0.000000e+00> : vector<8xf32>
    %12 = vector.multi_reduction <add>, %11, %cst_4 [1] : vector<8x128xf32> to vector<8xf32>
    %13 = vector.shape_cast %12 : vector<8xf32> to vector<8x1xf32>
    %cst_5 = arith.constant dense<0.000000e+00> : vector<8xf32>
    %14 = vector.multi_reduction <add>, %1, %cst_5 [1] : vector<8x128xf32> to vector<8xf32>
    %15 = vector.shape_cast %14 : vector<8xf32> to vector<8x1xf32>
    %16 = arith.mulf %15, %10 : vector<8x1xf32>
    %17 = arith.subf %16, %13 : vector<8x1xf32>
    %c8_i32 = arith.constant 8 : i32
    %18 = arith.muli %arg0, %c8_i32 : i32
    %19 = tpu.iota {dimensions = array<i32: 0>} : vector<8x1xi32>
    %20 = vector.broadcast %18 : i32 to vector<8x1xi32>
    %21 = arith.addi %20, %19 : vector<8x1xi32>
    %c20_i32 = arith.constant 20 : i32
    %22 = vector.broadcast %c20_i32 : i32 to vector<8x1xi32>
    %23 = arith.cmpi slt, %21, %22 : vector<8x1xi32>
    %cst_6 = arith.constant 0.000000e+00 : f32
    %24 = vector.broadcast %cst_6 : f32 to vector<8x1xf32>
    %25 = arith.select %23, %17, %24 : vector<8x1xi1>, vector<8x1xf32>
    %26 = vector.shape_cast %25 : vector<8x1xf32> to vector<1x8x1xf32>
    %cst_7 = arith.constant dense<0.000000e+00> : vector<1xf32>
    %27 = vector.multi_reduction <add>, %26, %cst_7 [1, 2] : vector<1x8x1xf32> to vector<1xf32>
    %28 = vector.shape_cast %27 : vector<1xf32> to vector<1x1x1xf32>
    %29 = vector.extract %28[0, 0, 0] : f32 from vector<1x1x1xf32>
    %c0_i32 = arith.constant 0 : i32
    %30 = arith.cmpi eq, %arg0, %c0_i32 : i32
    %31 = arith.extui %30 : i1 to i32
    %c0_i32_8 = arith.constant 0 : i32
    %32 = arith.cmpi ne, %31, %c0_i32_8 : i32
    scf.if %32 {
      %cst_15 = arith.constant 0.000000e+00 : f32
      %c0_16 = arith.constant 0 : index
      %39 = memref.load %arg4[%c0_16] : memref<1xf32, #tpu.memory_space<smem>>
      memref.store %cst_15, %arg4[%c0_16] : memref<1xf32, #tpu.memory_space<smem>>
    } else {
    }
    %c0_9 = arith.constant 0 : index
    %33 = memref.load %arg4[%c0_9] : memref<1xf32, #tpu.memory_space<smem>>
    %34 = arith.addf %33, %29 : f32
    %c0_10 = arith.constant 0 : index
    %35 = memref.load %arg4[%c0_10] : memref<1xf32, #tpu.memory_space<smem>>
    memref.store %34, %arg4[%c0_10] : memref<1xf32, #tpu.memory_space<smem>>
    %c0_11 = arith.constant 0 : index
    %36 = memref.load %arg4[%c0_11] : memref<1xf32, #tpu.memory_space<smem>>
    %cst_12 = arith.constant 5.000000e-02 : f32
    %37 = arith.mulf %36, %cst_12 : f32
    %c0_13 = arith.constant 0 : index
    %c0_14 = arith.constant 0 : index
    %38 = memref.load %arg3[%c0_13, %c0_14] : memref<1x1xf32, #tpu.memory_space<smem>>
    memref.store %37, %arg3[%c0_13, %c0_14] : memref<1x1xf32, #tpu.memory_space<smem>>
    return
  }
  func.func @transform_0(%arg0: i32) -> (i32, i32) {
    %c0_i32 = arith.constant 0 : i32
    %c0_i32_0 = arith.constant 0 : i32
    return %arg0, %c0_i32 : i32, i32
  }
  func.func @transform_1(%arg0: i32) -> (i32, i32) {
    %c0_i32 = arith.constant 0 : i32
    %c0_i32_0 = arith.constant 0 : i32
    return %arg0, %c0_i32 : i32, i32
  }
  func.func @transform_2(%arg0: i32) -> (i32, i32) {
    %c0_i32 = arith.constant 0 : i32
    %c0_i32_0 = arith.constant 0 : i32
    %c0_i32_1 = arith.constant 0 : i32
    return %c0_i32, %c0_i32_0 : i32, i32
  }
}

</mosaic_0001>

<bundles_post_ra>
// kernel: tpu_custom_call.1
= control target key start
LH: loop header
LB: loop body
LE: loop exit
PB: predicated region body
PF: predicated region fallthrough
CT: control target
= control target key end

     0   :  { %7 = vsyncpa [#allocation4], 0  ;;  %s701_s0 = inlined_call_operand.hbm [shape: f32[20,128], index: 0, kind: input, shape index: {}]   ;;  %s702_s1 = inlined_call_operand.hbm [shape: f32[20,128], index: 1, kind: input, shape index: {}]   ;;  %s703_s2 = inlined_call_operand.hbm [shape: f32[1,1], index: 2, kind: output, shape index: {}]  }
   0x1   :  { %9 = vsyncpa [#allocation4 + $0x1], 0 }
   0x2   :  { %10 = vsyncpa [#allocation7], 0 }
   0x3   :  { %12 = vsyncpa [#allocation7 + $0x1], 0 }
   0x4   :  { %13 = vsyncpa [#allocation5], 0  ;;  %s526_s9 = smov 0   ;;  %s528_s10 = smov 0  }
   0x5   :  { %s530_s11 = smov 0   ;;  %s532_s12 = smov 0  }
   0x6 LB: > { %s545_s13 = sadd.s32 4294967295, %s505_s12   ;;  %s548_s14 = sadd.s32 1, %s505_s12   ;;  %s505_s12 = sphi %s532_s12, %s717_s12   ;;  %s501_s11 = sphi %s530_s11, %s716_s11   ;;  %s497_s10 = sphi %s528_s10, %s715_s10   ;;  %s493_s9 = sphi %s526_s9, %s714_s9  }
   0x7   : > { %s23_s15 = ssub.s32 %s505_s12, %s548_s14  ;;  %s26_s16 = sadd.s32 1, %s501_s11 }
   0x8   : > { %p24_p0 = scmp.eq.s32.totalorder %s23_s15, 0  ;;  %p33_p1 = scmp.ne.s32.totalorder %s501_s11, %s497_s10 }
   0x9   : > { %p34_p2 = scmp.eq.s32.totalorder %s505_s12, 0  ;;  %p39_p3 = scmp.ne.s32.totalorder %s497_s10, %s493_s9 }
   0xa   : > { %s558_s17 = scalar_select %p24_p0, %s501_s11, %s26_s16  }
   0xb   : > { %p35_p4 = por %p34_p2, %p33_p1  ;;  %p704_p5 = scmp.eq.s32.totalorder %s545_s13, 0 }
   0xc   : > { %p349_p6 = scmp.lt.s32.totalorder %s505_s12, 3  ;;  %s569_s19 = sand.u32 1, %s501_s11  }
   0xd   : > { %p564_p7 = por %p704_p5, %p39_p3  ;;  %s317_s20 = sshll.u32 %s569_s19, 3 }
   0xe   : > { %s318_s21 = sshll.u32 %s505_s12, 7  ;;  %s114_s25 = scalar_lea.vmem [#allocation3], %s317_s20 }
   0xf   : > { %s706_s18 = scalar_select %p564_p7, 1, 0 }
  0x10   : > { %s578_s24 = scalar_lea.hbm %s701_s0, %s318_s21  ;;  %s121_s26 = sshll.u32 %s114_s25, 4  ;;  %s582_s26 = int_to_ptr.vmem [resolvable:$true] %s121_s26 }
  0x11   : > { %p584_p8 = pnand %p349_p6, %p35_p4  ;;  %s111_s28 = scalar_lea.sflag [#allocation4], %s569_s19 }
  0x12   : > { %s391_s29 = scalar_lea.hbm %s578_s24, 128  ;;  %s396_s4 = scalar_lea.hbm %s701_s0, 384 }
  0x13   : > { %p392_p11 = scmp.ne.s32.totalorder %s578_s24, %s391_s29  ;;  %p393_p12 = pneg %p584_p8 }
  0x14   : > { %p397_p1 = scmp.lt.u32.totalorder %s578_s24, %s701_s0  ;;  %p398_p2 = scmp.lt.u32.totalorder %s396_s4, %s391_s29 }
  0x15   : > { %p394_p13 = pnand %p393_p12, %p392_p11  ;;  %p400_p4 = scmp.lt.u32.totalorder %s391_s29, %s578_s24 }
  0x16   : > { %p399_p3 = por %p398_p2, %p397_p1 }
  0x17   : > { %p395_p0 = pneg %p394_p13 }
  0x18   : > { %p401_p6 = por %p400_p4, %p399_p3 }
  0x1a   : > { %p402_p5 = pnand %p401_p6, %p395_p0 }
  0x1c   : > { %405 = shalt.err (!%p402_p5)
}
  0x1d   : > { %s406_s7 = scalar_lea.vmem %s582_s26, 128  ;;  %s507_s8 = smov [#allocation3]  }
  0x1e   : > { %p407_p11 = scmp.ne.s32.totalorder %s582_s26, %s406_s7  ;;  %s411_s9 = sshll.u32 %s507_s8, 4  ;;  %s412_s9 = int_to_ptr.vmem [resolvable:$false] %s411_s9 }
  0x1f   : > { %s413_s15 = scalar_lea.vmem %s412_s9, 256  ;;  %p414_p10 = scmp.lt.s32.totalorder %s582_s26, %s412_s9 }
  0x20   : > { %p409_p13 = pnand %p407_p11, %p393_p12  ;;  %p415_p1 = scmp.lt.s32.totalorder %s413_s15, %s406_s7 }
  0x22   : > { %p410_p9 = pneg %p409_p13  ;;  %p416_p2 = por %p415_p1, %p414_p10 }
  0x24   : > { %p417_p3 = pnand %p416_p2, %p410_p9 }
  0x26   : > { %420 = shalt.err (!%p417_p3)
}
  0x27   : > { %345 = dma.hbm_to_vmem [thread:$0]  (!%p584_p8), %s578_s24, 128, %s582_s26, %s111_s28  }
  0x28   : > { %p708_p5 = scmp.lt.s32.totalorder %s505_s12, 4  ;;  %p709_p0 = scmp.ge.s32.totalorder %s505_s12, 1 }
  0x29   : > { %s629_s25 = scalar_lea.hbm %s702_s1, %s318_s21  ;;  %s132_s29 = scalar_lea.vmem [#allocation6], %s317_s20 }
  0x2a   : > { %p620_p4 = pnand %p709_p0, %p708_p5  ;;  %s139_s30 = sshll.u32 %s132_s29, 4  ;;  %s140_s30 = int_to_ptr.vmem [resolvable:$true] %s139_s30 }
  0x2b   : > { %s129_s24 = scalar_lea.sflag [#allocation7], %s569_s19  ;;  %s421_s26 = scalar_lea.hbm %s629_s25, 128 }
  0x2c   : > { %s710_s16 = scalar_select %p620_p4, 1, 0 }
  0x2d   : > { %p422_p9 = scmp.ne.s32.totalorder %s629_s25, %s421_s26  ;;  %s426_s21 = scalar_lea.hbm %s702_s1, 384 }
  0x2e   : > { %p427_p11 = scmp.lt.u32.totalorder %s629_s25, %s702_s1  ;;  %p428_p13 = scmp.lt.u32.totalorder %s426_s21, %s421_s26 }
  0x2f   : > { %p424_p10 = pnand %p422_p9, %p393_p12  ;;  %p430_p2 = scmp.lt.u32.totalorder %s421_s26, %s629_s25 }
  0x30   : > { %p429_p1 = por %p428_p13, %p427_p11 }
  0x31   : > { %p425_p6 = pneg %p424_p10 }
  0x32   : > { %p431_p3 = por %p430_p2, %p429_p1 }
  0x34   : > { %p432_p5 = pnand %p431_p3, %p425_p6 }
  0x36   : > { %435 = shalt.err (!%p432_p5)
}
  0x37   : > { %s436_s19 = scalar_lea.vmem %s140_s30, 128  ;;  %s508_s20 = smov [#allocation6]  }
  0x38   : > { %p437_p0 = scmp.ne.s32.totalorder %s140_s30, %s436_s19  ;;  %s441_s5 = sshll.u32 %s508_s20, 4  ;;  %s442_s5 = int_to_ptr.vmem [resolvable:$false] %s441_s5 }
  0x39   : > { %s443_s6 = scalar_lea.vmem %s442_s5, 256  ;;  %p444_p7 = scmp.lt.s32.totalorder %s140_s30, %s442_s5 }
  0x3a   : > { %p439_p9 = pnand %p437_p0, %p393_p12  ;;  %p445_p4 = scmp.lt.s32.totalorder %s443_s6, %s436_s19 }
  0x3c   : > { %p440_p10 = pneg %p439_p9  ;;  %p446_p11 = por %p445_p4, %p444_p7 }
  0x3e   : > { %p447_p13 = pnand %p446_p11, %p440_p10 }
  0x40   : > { %450 = shalt.err (!%p447_p13)
}
  0x41   : > { %348 = dma.hbm_to_vmem [thread:$0]  (!%p584_p8), %s629_s25, 128, %s140_s30, %s129_s24  }
  0x42   : > { %p711_p6 = scmp.ne.s32.totalorder %s710_s16, 0 }
  0x43   : > { %s150_s7 = sand.u32 (!%p711_p6), 1, %s497_s10   ;;  %p712_p12 = scmp.ne.s32.totalorder (!%p711_p6), %s706_s18, 0 }
  0x44   : > { %148 = sbr.rel (%p711_p6) target bundleno = 614 (0x266), region = 28  ;;  %s322_s8 = sshll.u32 (!%p711_p6), %s150_s7, 3 }
  0x45   : > { %s151_s9 = scalar_lea.sflag (!%p711_p6), [#allocation4], %s150_s7  ;;  %s154_s15 = scalar_lea.vmem (!%p711_p6), [#allocation3], %s322_s8 }
  0x4b   : > { %480 = dma.done.wait (%p712_p12), %s151_s9, 128  }
  0x4c   : > { %482 = vsyncadd (%p712_p12), %s151_s9, 4294967168  ;;  %s160_s22 = scalar_lea.sflag [#allocation7], %s150_s7  ;;  %s163_s23 = scalar_lea.vmem [#allocation6], %s322_s8 }
  0x4d   : > { %484 = dma.done.wait (%p712_p12), %s160_s22, 128  }
  0x4e   : > { %486 = vsyncadd (%p712_p12), %s160_s22, 4294967168  ;;  %v184_v0 = vld [vmem:[%s154_s15] sm:$0xff]  ;;  %v185_v1 = vld [vmem:[%s163_s23] sm:$0xff]  ;;  %v204_v8 = vlaneseq  ;;  %s324_s27 = sshll.u32 %s545_s13, 3  ;;  %vm210_vm1 = vcmask 7168   ;;  %s509_s18 = smov 0.0  }
  0x4f   : > { %186 = vmax.xlane.f32.xlu0 %v184_v0  ;;  %199 = vadd.xlane.f32.xlu1 %v185_v1  ;;  %v196_v2 = vmul.f32 %v185_v1, %v184_v0  ;;  %v206_v11 = vstv %s324_s27  ;;  %p713_p7 = scmp.eq.s32.totalorder %s545_s13, 0  ;;  %p351_p8 = scmp.eq.s32.totalorder %s545_s13, 2 }
  0x50   : > { %v205_v10 = vshrl.u32 %v204_v8, 7  ;;  %s451_s12 = scalar_lea.hbm %s703_s2, 16 }
  0x51   : > { %337 = sst [smem:[#allocation2]] (%p713_p7), %s509_s18  ;;  %p452_p4 = scmp.ne.s32.totalorder %s703_s2, %s451_s12 }
  0x52   : > { %v207_v14 = vadd.s32 %v206_v11, %v205_v10  ;;  %s227_s16 = sld [smem:[#allocation2]]  ;;  %p457_p3 = scmp.lt.u32.totalorder %s451_s12, %s703_s2 }
  0x53   : > { %197 = vadd.xlane.f32.xlu1 %v196_v2  ;;  %p453_p1 = pnand %p452_p4, %p351_p8 }
  0x54   : > { %vm208_vm0 = vcmp.lt.s32.totalorder %v207_v14, 20 }
  0x55   : > { %p454_p2 = pneg %p453_p1 }
  0x57   : > { %p459_p5 = pnand %p457_p3, %p454_p2 }
  0xdc   : > { %v187_v3 = vpop.xlane.xlu0 %186  ;;  %v200_v9 = vpop.xlane.xlu1 %199 }
  0xdd   : > { %v188_v4 = vsub.f32 %v184_v0, %v187_v3 }
  0xdf   : > { %v189_v5 = vmul.f32 1.442695, %v188_v4 }
  0xe0   : > { %v198_v16 = vpop.xlane.xlu1 %197 }
  0xe1   : > { %387 = vpow2.f32 %v189_v5 }
  0xeb   : > { %v388_v6 = vpop.eup %387 }
  0xec   : > { %191 = vadd.xlane.f32.xlu0 %v388_v6 }
 0x179   : > { %v192_v7 = vpop.xlane.xlu0 %191 }
 0x17a   : > { %389 = vlog2.f32 %v192_v7 }
 0x184   : > { %v390_v12 = vpop.eup %389 }
 0x185   : > { %v194_v13 = vmul.f32 0.6931472, %v390_v12 }
 0x187   : > { %v195_v15 = vadd.f32 %v194_v13, %v187_v3 }
 0x189   : > { %v201_v17 = vmul.f32 %v200_v9, %v195_v15 }
 0x18b   : > { %v202_v18 = vsub.f32 %v201_v17, %v198_v16 }
 0x18d   : > { %v209_v19 = vsel %vm208_vm0, %v202_v18, 0.0 }
 0x18e   : > { %v211_v20 = vsel %vm210_vm1, %v209_v19, 0.0 }
 0x18f   : > { %212 = vadd.xlane.f32.xlu0 %v211_v20 }
 0x21c   : > { %v213_v21 = vpop.xlane.xlu0 %212 }
 0x21d   : > { %v214_v22 = vrot.slane %v213_v21, 4 }
 0x21f   : > { %v215_v23 = vadd.f32 %v214_v22, %v213_v21 }
 0x221   : > { %v216_v24 = vrot.slane %v215_v23, 2 }
 0x223   : > { %v217_v25 = vadd.f32 %v216_v24, %v215_v23 }
 0x225   : > { %v218_v26 = vrot.slane %v217_v25, 1 }
 0x227   : > { %v219_v27 = vadd.f32 %v218_v26, %v217_v25 }
 0x229   : > { %330 = vpush %v219_v27 }
 0x25a   : > { %s331_s25 = spop %330 }
 0x25b   : > { %s228_s29 = sadd.f32 %s331_s25, %s227_s16 }
 0x25d   : > { %230 = sst [smem:[#allocation2]] %s228_s29  ;;  %s232_s30 = smul.f32 0.05, %s228_s29 }
 0x25f   : > { %234 = sst [smem:[#allocation8]] %s232_s30 }
 0x260   : > { %462 = shalt.err (!%p459_p5)
}
 0x261   : > { %s510_s19 = smov [#allocation8]  }
 0x262   : > { %339 = dma.smem_to_hbm (%p351_p8), %s510_s19, 16, %s703_s2, [#allocation5]  }
 0x263   : > { %488 = dma.done.wait (%p351_p8), [#allocation5], 16  }
 0x264   : > { %490 = vsyncadd (%p351_p8), [#allocation5], 4294967280 }
 0x265   : > { %248 = sfence }
 0x266 PF: > { %p16_p0 = scmp.ge.s32.totalorder %s548_s14, 5   ;;  %s714_s9 = smov %s497_s10 }
 0x267   : > { %s715_s10 = smov %s501_s11  ;;  %s716_s11 = smov %s558_s17 }
 0x268   : > { %s717_s12 = smov %s548_s14  ;;  %18 = sbr.rel (!%p16_p0) target bundleno = 6 (0x6), region = 85 }
 0x26f   :  { %254 = vsyncpa [#allocation4], 1 }
 0x270   :  { %256 = vsyncpa [#allocation4 + $0x1], 1 }
 0x271   :  { %257 = vsyncpa [#allocation7], 1 }
 0x272   :  { %259 = vsyncpa [#allocation7 + $0x1], 1 }
 0x273   :  { %260 = vsyncpa [#allocation5], 1 }
 0x274   :  { %262 = vsyncpa [#allocation5 + $0x1], 1 }

</bundles_post_ra>
